<compile_context>
chip_gen: v7x
topology: tpu7x:2x2x1
jax: 0.10.0
libtpu: 0.0.40
codegen_flags: <defaults>
</compile_context>

<pallas_src>
import jax
import jax.numpy as jnp
from jax.experimental import pallas as pl
from jax.experimental.pallas import tpu as pltpu


def _round_up(x, m):
    return ((x + m - 1) // m) * m


def _largest_divisor_leq(n, cap):
    cap = max(1, min(n, cap))
    for d in range(cap, 0, -1):
        if n % d == 0:
            return d
    return 1


def _patch_embed_kernel(x_ref, w_ref, pos_ref, o_ref):
    # x_ref:   (TB, TM, Kp)  bf16 flattened patches (zero-padded K)
    # w_ref:   (Kp, D)       bf16 conv weight as a matmul operand
    # pos_ref: (TM, D)       f32  position rows for these TM patch positions
    # o_ref:   (TB, TM, D)   output patch embeddings (patch rows only)
    tb, tm, kp = x_ref.shape
    x = x_ref[...].reshape(tb * tm, kp)                     # merge batch tiles
    acc = jnp.dot(x, w_ref[...],
                  preferred_element_type=jnp.float32)       # MXU, f32 accum
    acc = acc.reshape(tb, tm, -1) + pos_ref[...][None, :, :]
    o_ref[...] = acc.astype(o_ref.dtype)


@jax.jit
def clip_vision_embeddings(pixel_values, conv_weight, class_embedding,
                           position_embedding):
    """
    pixel_values:       (B, 3, H, W)  float32, NCHW
    conv_weight:        (D, 3, P, P)  float32 (nn.Conv2d weight, bias=False)
    class_embedding:    (D,)          float32
    position_embedding: (NP+1, D)     float32 (nn.Embedding weight)
    returns:            (B, NP+1, D)  float32
    """
    B, C, H, W = pixel_values.shape
    D, Cw, P, _ = conv_weight.shape
    assert C == Cw == 3
    gh, gw = H // P, W // P
    NP = gh * gw
    K = C * P * P
    out_dtype = pixel_values.dtype

    # ---- glue: extract non-overlapping PxP patches, channel-major (c,ph,pw)
    # flattening so `patches @ W` equals the stride-P conv.
    x = pixel_values.reshape(B, C, gh, P, gw, P)
    x = jnp.transpose(x, (0, 2, 4, 1, 3, 5)).reshape(B, NP, K)

    # ---- conv weight (D, C, P, P) -> (K, D)   (hoist at load time in practice)
    w = jnp.transpose(conv_weight.reshape(D, K))

    # ---- tiling: pad K to a lane multiple, patch axis to an 8-aligned tile.
    K_pad = _round_up(K, 128)
    NP8 = _round_up(NP, 8)
    if NP8 <= 512:
        TM = NP8
    else:
        ntiles = pl.cdiv(NP8, 512)
        TM = _round_up(pl.cdiv(NP8, ntiles), 8)
    NP_pad = _round_up(NP8, TM)
    TB = _largest_divisor_leq(B, max(1, 512 // TM))   # batch elems per step

    x = jnp.pad(x, ((0, 0), (0, NP_pad - NP), (0, K_pad - K))).astype(jnp.bfloat16)
    w = jnp.pad(w, ((0, K_pad - K), (0, 0))).astype(jnp.bfloat16)
    pos_patch = jnp.pad(position_embedding[1:].astype(jnp.float32),
                        ((0, NP_pad - NP), (0, 0)))          # (NP_pad, D)

    grid = (B // TB, NP_pad // TM)
    patch_out = pl.pallas_call(
        _patch_embed_kernel,
        out_shape=jax.ShapeDtypeStruct((B, NP_pad, D), out_dtype),
        grid_spec=pltpu.PrefetchScalarGridSpec(
            num_scalar_prefetch=0,
            grid=grid,
            in_specs=[
                pl.BlockSpec((TB, TM, K_pad), lambda b, t: (b, t, 0)),
                pl.BlockSpec((K_pad, D), lambda b, t: (0, 0)),   # resident
                pl.BlockSpec((TM, D), lambda b, t: (t, 0)),
            ],
            out_specs=pl.BlockSpec((TB, TM, D), lambda b, t: (b, t, 0)),
        ),
        compiler_params=pltpu.CompilerParams(
            dimension_semantics=("parallel", "parallel"),
            vmem_limit_bytes=48 * 1024 * 1024),
    )(x, w, pos_patch)

    # ---- class row: batch-independent, added outside the kernel (no in-kernel
    # concat, keeps the kernel's big store sublane/lane aligned).
    row0 = (class_embedding.astype(jnp.float32)
            + position_embedding[0].astype(jnp.float32)).astype(out_dtype)
    cls_rows = jnp.broadcast_to(row0[None, None, :], (B, 1, D))
    return jnp.concatenate([cls_rows, patch_out[:, :NP, :]], axis=1)


def reference(pixel_values, conv_weight, class_embedding, position_embedding):
    # Pure-JAX reference mirroring the PyTorch forward (for correctness check).
    B, C, H, W = pixel_values.shape
    D, _, P, _ = conv_weight.shape
    patch_embeds = jax.lax.conv_general_dilated(
        pixel_values, conv_weight, window_strides=(P, P), padding="VALID",
        dimension_numbers=("NCHW", "OIHW", "NCHW"))        # (B, D, gh, gw)
    patch_embeds = patch_embeds.reshape(B, D, -1).transpose(0, 2, 1)
    class_embeds = jnp.broadcast_to(class_embedding, (B, 1, D))
    emb = jnp.concatenate([class_embeds, patch_embeds], axis=1)
    return emb + position_embedding[None, :, :]


if __name__ == "__main__":
    # Small config consistent with the module: hidden_size=32, image_size=16,
    # patch_size=4  ->  num_patches = (16 // 4) ** 2 = 16, num_positions = 17.
    B, C, H, W = 2, 3, 16, 16
    D, P = 32, 4
    NP = (H // P) * (W // P)
    NPOS = NP + 1

    key = jax.random.PRNGKey(0)
    k_px, k_conv, k_cls, k_pos = jax.random.split(key, 4)

    pixel_values = jax.random.normal(k_px, (B, C, H, W), jnp.float32)
    conv_weight = jax.random.normal(k_conv, (D, C, P, P), jnp.float32) * 0.02
    class_embedding = jax.random.normal(k_cls, (D,), jnp.float32)
    position_embedding = jax.random.normal(k_pos, (NPOS, D), jnp.float32) * 0.02

    out = clip_vision_embeddings(pixel_values, conv_weight, class_embedding,
                                 position_embedding)
    out = jax.block_until_ready(out)

    ref = reference(pixel_values, conv_weight, class_embedding,
                    position_embedding)
    assert out.shape == (B, NPOS, D)
    # bf16 MXU operands with f32 accumulation -> loosened tolerance vs f32 ref.
    assert jnp.allclose(out, ref, atol=2e-2, rtol=2e-2), \
        float(jnp.max(jnp.abs(out - ref)))
    print("KERNEL_OK")
</pallas_src>

<mosaic_0001>
module attributes {stable_mosaic.version = 11 : i64} {
  func.func @_patch_embed_kernel(%arg0: i32, %arg1: i32, %arg2: memref<2x16x128xbf16, #tpu.memory_space<vmem>>, %arg3: memref<128x32xbf16, #tpu.memory_space<vmem>>, %arg4: memref<16x32xf32, #tpu.memory_space<vmem>>, %arg5: memref<2x16x32xf32, #tpu.memory_space<vmem>>) attributes {dimension_semantics = [#tpu.dimension_semantics<parallel>, #tpu.dimension_semantics<parallel>], iteration_bounds = array<i64: 1, 1>, scalar_prefetch = 0 : i64, scratch_operands = 0 : i64, tpu.core_type = #tpu.core_type<tc>, window_params = [{transform_indices = @transform_0, window_bounds = array<i64: 2, 16, 128>}, {pipeline_mode = #tpu.pipeline_mode<synchronous>, transform_indices = @transform_1, window_bounds = array<i64: 128, 32>}, {transform_indices = @transform_2, window_bounds = array<i64: 16, 32>}, {transform_indices = @transform_3, window_bounds = array<i64: 2, 16, 32>}]} {
    %c0 = arith.constant 0 : index
    %c0_0 = arith.constant 0 : index
    %c0_1 = arith.constant 0 : index
    %0 = vector.load %arg2[%c0, %c0_0, %c0_1] : memref<2x16x128xbf16, #tpu.memory_space<vmem>>, vector<2x16x128xbf16>
    %1 = vector.shape_cast %0 : vector<2x16x128xbf16> to vector<32x128xbf16>
    %c0_2 = arith.constant 0 : index
    %c0_3 = arith.constant 0 : index
    %2 = vector.load %arg3[%c0_2, %c0_3] : memref<128x32xbf16, #tpu.memory_space<vmem>>, vector<128x32xbf16>
    %cst = arith.constant dense<0.000000e+00> : vector<32x32xf32>
    %3 = tpu.matmul %1, %2, %cst {dimension_numbers = #tpu.dot_dimension_numbers<[1], [0], [0], [1], [0, 0, 1, 1], [], []>} : vector<32x128xbf16>, vector<128x32xbf16>, vector<32x32xf32> -> vector<32x32xf32>
    %4 = vector.shape_cast %3 : vector<32x32xf32> to vector<2x16x32xf32>
    %c0_4 = arith.constant 0 : index
    %c0_5 = arith.constant 0 : index
    %5 = vector.load %arg4[%c0_4, %c0_5] : memref<16x32xf32, #tpu.memory_space<vmem>>, vector<16x32xf32>
    %6 = vector.shape_cast %5 : vector<16x32xf32> to vector<1x16x32xf32>
    %7 = vector.broadcast %6 : vector<1x16x32xf32> to vector<2x16x32xf32>
    %8 = arith.addf %4, %7 : vector<2x16x32xf32>
    %c0_6 = arith.constant 0 : index
    %c0_7 = arith.constant 0 : index
    %c0_8 = arith.constant 0 : index
    %9 = vector.load %arg5[%c0_6, %c0_7, %c0_8] : memref<2x16x32xf32, #tpu.memory_space<vmem>>, vector<2x16x32xf32>
    tpu.vector_store %arg5[%c0_6, %c0_7, %c0_8], %8 {strides = array<i32>} : memref<2x16x32xf32, #tpu.memory_space<vmem>>, vector<2x16x32xf32>,
    return
  }
  func.func @transform_0(%arg0: i32, %arg1: i32) -> (i32, i32, i32) {
    %c0_i32 = arith.constant 0 : i32
    %c0_i32_0 = arith.constant 0 : i32
    return %arg0, %arg1, %c0_i32 : i32, i32, i32
  }
  func.func @transform_1(%arg0: i32, %arg1: i32) -> (i32, i32) {
    %c0_i32 = arith.constant 0 : i32
    %c0_i32_0 = arith.constant 0 : i32
    %c0_i32_1 = arith.constant 0 : i32
    return %c0_i32, %c0_i32_0 : i32, i32
  }
  func.func @transform_2(%arg0: i32, %arg1: i32) -> (i32, i32) {
    %c0_i32 = arith.constant 0 : i32
    %c0_i32_0 = arith.constant 0 : i32
    return %arg1, %c0_i32 : i32, i32
  }
  func.func @transform_3(%arg0: i32, %arg1: i32) -> (i32, i32, i32) {
    %c0_i32 = arith.constant 0 : i32
    %c0_i32_0 = arith.constant 0 : i32
    return %arg0, %arg1, %c0_i32 : i32, i32, i32
  }
}

</mosaic_0001>

<bundles_post_ra>
// kernel: clip_vision_embeddings.1
= control target key start
LH: loop header
LB: loop body
LE: loop exit
PB: predicated region body
PF: predicated region fallthrough
CT: control target
= control target key end

     0   :  { %vm150_vm0 = vcmask 261120   ;;  %s277_s1 = inlined_call_operand.vmem [shape: bf16[128,32], index: 1, kind: input, shape index: {}]   ;;  %s278_s0 = inlined_call_operand.vmem [shape: bf16[2,16,128], index: 0, kind: input, shape index: {}]   ;;  %s279_s2 = inlined_call_operand.vmem [shape: f32[16,32], index: 2, kind: input, shape index: {}]   ;;  %s280_s3 = inlined_call_operand.vmem [shape: f32[2,16,32], index: 3, kind: output, shape index: {}]  }
   0x1   :  { %v199_v0 = vld [vmem:[%s277_s1] sm:$0xff]   ;;  %v200_v1 = vld [vmem:[%s277_s1 + $0x8] sm:$0xff]   ;;  %v201_v2 = vld [vmem:[%s277_s1 + $0x10] sm:$0xff]  }
   0x2   :  { %179 = vmatprep.subr.bf16.mxu0 %v199_v0  ;;  %v202_v3 = vld [vmem:[%s277_s1 + $0x18] sm:$0xff]   ;;  %v207_v4 = vld [vmem:[%s278_s0] sm:$0xff]   ;;  %v204_v6 = vld [vmem:[%s277_s1 + $0x28] sm:$0xff]  }
   0x3   :  { %180 = vmatpush3.bf16.msra.mxu0 %v199_v0  ;;  %195 = vmatprep.mubr.bf16.mxu0 %v207_v4  ;;  %v203_v5 = vld [vmem:[%s277_s1 + $0x20] sm:$0xff]   ;;  %v205_v7 = vld [vmem:[%s277_s1 + $0x30] sm:$0xff]   ;;  %v206_v8 = vld [vmem:[%s277_s1 + $0x38] sm:$0xff]  }
   0x4   :  { %181 = vmatprep.subr.bf16.mxu0 %v200_v1  ;;  %v208_v9 = vld [vmem:[%s278_s0 + $0x8] sm:$0xff]   ;;  %v144_v10 = vld [vmem:[%s279_s2] sm:$0xff] }
   0x5   :  { %v145_v12 = vld [vmem:[%s279_s2 + $0x8] sm:$0xff] }
   0x7   :  { %182 = vmatpush3.bf16.msra.mxu0 %v200_v1 }
   0x8   :  { %183 = vmatprep.subr.bf16.mxu0 %v201_v2 }
   0xb   :  { %184 = vmatpush3.bf16.msra.mxu0 %v201_v2 }
   0xc   :  { %185 = vmatprep.subr.bf16.mxu0 %v202_v3 }
   0xf   :  { %186 = vmatpush3.bf16.msra.mxu0 %v202_v3 }
  0x10   :  { %187 = vmatprep.subr.bf16.mxu0 %v203_v5 }
  0x13   :  { %188 = vmatpush3.bf16.msra.mxu0 %v203_v5 }
  0x14   :  { %189 = vmatprep.subr.bf16.mxu0 %v204_v6 }
  0x17   :  { %190 = vmatpush3.bf16.msra.mxu0 %v204_v6 }
  0x18   :  { %191 = vmatprep.subr.bf16.mxu0 %v205_v7 }
  0x1b   :  { %192 = vmatpush3.bf16.msra.mxu0 %v205_v7 }
  0x1c   :  { %193 = vmatprep.subr.bf16.mxu0 %v206_v8 }
  0x1f   :  { %194 = vmatpush3.bf16.msra.mxu0 %v206_v8 }
  0x22   :  { %196 = vmatmul.mubr.bf16.vlgmr.msra.gmra.mrb[0].mxu0 %v208_v9 }
  0xf5   :  { %v197_v11 = vpop.f32.mrb[0].mxu0 }
  0xf6   :  { %v148_v13 = vadd.f32 %v197_v11, %v144_v10  ;;  %v129_v14 = vpop.f32.mrb[1].mxu0 }
  0xf7   :  { %v146_v15 = vadd.f32 %v144_v10, %v129_v14  ;;  %v198_v16 = vpop.f32.mrb[2].mxu0 }
  0xf8   :  { %153 = vst.msk [vmem:[%s280_s3 + $0x10] sm:$0xff] %vm150_vm0, %v148_v13  ;;  %v149_v17 = vadd.f32 %v198_v16, %v145_v12  ;;  %v132_v18 = vpop.f32.mrb[3].mxu0 }
  0xf9   :  { %151 = vst.msk [vmem:[%s280_s3] sm:$0xff] %vm150_vm0, %v146_v15  ;;  %v147_v19 = vadd.f32 %v145_v12, %v132_v18 }
  0xfa   :  { %154 = vst.msk [vmem:[%s280_s3 + $0x18] sm:$0xff] %vm150_vm0, %v149_v17 }
  0xfb   :  { %152 = vst.msk [vmem:[%s280_s3 + $0x8] sm:$0xff] %vm150_vm0, %v147_v19 }

</bundles_post_ra>
